<compile_context>
chip_gen: v6e
topology: v6e:2x2x1
jax: 0.10.0
libtpu: 0.0.40
codegen_flags: <defaults>
</compile_context>

<pallas_src>
import functools

import jax
import jax.numpy as jnp
from jax.experimental import pallas as pl
from jax.experimental.pallas import tpu as pltpu

_EPS = 1e-5


def _round_up(x, m):
    return ((x + m - 1) // m) * m


def _actor_kernel(s_ref, w1_ref, b1_ref, w2_ref, b2_ref, w3_ref, b3_ref,
                  o_ref, xpad_ref):
    """One full minibatch forward per grid step; everything VMEM-resident."""
    s_feat = s_ref.shape[-1]
    k_pad = xpad_ref.shape[-1]

    # --- in-kernel zero-pad of the state feature dim to lane-dense K=128 ---
    if s_feat == k_pad:
        x = s_ref[...]                                           # (B, Kp) f32
    else:
        xpad_ref[...] = jnp.zeros_like(xpad_ref)
        xpad_ref[:, :s_feat] = s_ref[...]                        # masked lane store
        x = xpad_ref[...]                                        # (B, Kp) f32

    # fc1 + ReLU  (bf16 MXU operands, f32 accumulate, f32 elementwise)
    h1 = jnp.dot(x.astype(jnp.bfloat16), w1_ref[...],
                 preferred_element_type=jnp.float32)
    h1 = jnp.maximum(h1 + b1_ref[...], 0.0)                      # (B, F1)

    # BatchNorm1d, training mode: one-pass full-batch stats (biased variance),
    # gamma=1, beta=0 (fresh BatchNorm1d parameters), eps=1e-5.
    inv_b = 1.0 / h1.shape[0]
    mean = jnp.sum(h1, axis=0, keepdims=True) * inv_b            # (1, F1)
    sq = jnp.sum(h1 * h1, axis=0, keepdims=True) * inv_b
    var = jnp.maximum(sq - mean * mean, 0.0)
    h1 = (h1 - mean) * jax.lax.rsqrt(var + _EPS)

    # fc2 + ReLU
    h2 = jnp.dot(h1.astype(jnp.bfloat16), w2_ref[...],
                 preferred_element_type=jnp.float32)
    h2 = jnp.maximum(h2 + b2_ref[...], 0.0)                      # (B, F2)

    # fc3 + tanh  (output columns padded to a lane-dense 128, bf16 writeback)
    out = jnp.dot(h2.astype(jnp.bfloat16), w3_ref[...],
                  preferred_element_type=jnp.float32)
    o_ref[...] = jnp.tanh(out + b3_ref[...]).astype(o_ref.dtype)  # (B, Np)


def prepare_actor_params(w1, b1, w2, b2, w3, b3):
    """One-time preprocessing: pad for lane density, cast matmul weights to bf16.

    Input weights are (in, out) f32 (transposed vs. PyTorch), biases (1, out).
    """
    state_size = w1.shape[0]
    action_size = w3.shape[1]
    k_pad = _round_up(state_size, 128)
    n_pad = _round_up(action_size, 128)

    w1p = jnp.zeros((k_pad, w1.shape[1]), jnp.bfloat16)
    w1p = w1p.at[:state_size, :].set(w1.astype(jnp.bfloat16))
    w3p = jnp.zeros((w3.shape[0], n_pad), jnp.bfloat16)
    w3p = w3p.at[:, :action_size].set(w3.astype(jnp.bfloat16))
    b3p = jnp.zeros((1, n_pad), jnp.float32).at[:, :action_size].set(b3)

    padded = (w1p, b1.astype(jnp.float32),
              w2.astype(jnp.bfloat16), b2.astype(jnp.float32),
              w3p, b3p)
    return padded, state_size, action_size


@functools.partial(jax.jit, static_argnames=("state_size", "action_size"))
def actor_forward(state, w1p, b1, w2p, b2, w3p, b3p, *, state_size,
                  action_size):
    """state: (B, state_size) or (M, B, state_size) f32.

    Returns (B, action_size) or (M, B, action_size) f32 actions. Each
    minibatch (size B) uses its own exact BatchNorm batch statistics.
    """
    squeeze_mb = state.ndim == 2
    if squeeze_mb:
        state = state[None]
    state = state.astype(jnp.float32)
    num_mb, batch, s_feat = state.shape

    k_pad = w1p.shape[0]
    f1 = w1p.shape[1]
    f2 = w2p.shape[1]
    n_pad = w3p.shape[1]

    const2d = lambda m: (0, 0)   # weights/biases: VMEM-resident across grid steps

    out_padded = pl.pallas_call(
        _actor_kernel,
        out_shape=jax.ShapeDtypeStruct((num_mb, batch, n_pad), jnp.bfloat16),
        grid_spec=pltpu.PrefetchScalarGridSpec(
            num_scalar_prefetch=0,
            grid=(num_mb,),
            in_specs=[
                pl.BlockSpec((pl.Squeezed(), batch, s_feat),
                             lambda m: (m, 0, 0)),
                pl.BlockSpec((k_pad, f1), const2d),
                pl.BlockSpec((1, f1), const2d),
                pl.BlockSpec((f1, f2), const2d),
                pl.BlockSpec((1, f2), const2d),
                pl.BlockSpec((f2, n_pad), const2d),
                pl.BlockSpec((1, n_pad), const2d),
            ],
            out_specs=pl.BlockSpec((pl.Squeezed(), batch, n_pad),
                                   lambda m: (m, 0, 0)),
            scratch_shapes=[pltpu.VMEM((batch, k_pad), jnp.float32)],
        ),
        compiler_params=pltpu.CompilerParams(
            dimension_semantics=("parallel",),
            vmem_limit_bytes=32 * 1024 * 1024),
    )(state, w1p, b1, w2p, b2, w3p, b3p)

    # Single fused slice + cast back to f32 actions.
    actions = out_padded[..., :action_size].astype(jnp.float32)
    if squeeze_mb:
        actions = actions[0]
    return actions


def make_params(key, state_size, action_size, fc1_units=256, fc2_units=128):
    """Deterministic init mirroring Actor.reset_parameters ranges (f32).

    Note: hidden_init uses weight.size()[0] == out_features (as in the
    reference code), so lim = 1/sqrt(out_features) for fc1/fc2.
    """
    k = jax.random.split(key, 6)
    lim1 = 1.0 / jnp.sqrt(jnp.float32(fc1_units))
    lim2 = 1.0 / jnp.sqrt(jnp.float32(fc2_units))
    # weights stored transposed: (in, out)
    w1 = jax.random.uniform(k[0], (state_size, fc1_units), jnp.float32,
                            -lim1, lim1)
    w2 = jax.random.uniform(k[1], (fc1_units, fc2_units), jnp.float32,
                            -lim2, lim2)
    w3 = jax.random.uniform(k[2], (fc2_units, action_size), jnp.float32,
                            -3e-3, 3e-3)
    # biases: PyTorch Linear default uniform(+-1/sqrt(in_features)); shape (1, out)
    b1 = jax.random.uniform(k[3], (1, fc1_units), jnp.float32,
                            -1.0 / jnp.sqrt(jnp.float32(state_size)),
                            1.0 / jnp.sqrt(jnp.float32(state_size)))
    b2 = jax.random.uniform(k[4], (1, fc2_units), jnp.float32,
                            -1.0 / jnp.sqrt(jnp.float32(fc1_units)),
                            1.0 / jnp.sqrt(jnp.float32(fc1_units)))
    b3 = jax.random.uniform(k[5], (1, action_size), jnp.float32,
                            -1.0 / jnp.sqrt(jnp.float32(fc2_units)),
                            1.0 / jnp.sqrt(jnp.float32(fc2_units)))
    return w1, b1, w2, b2, w3, b3


if __name__ == "__main__":
    key = jax.random.PRNGKey(0)
    k_state, k_params = jax.random.split(key)

    num_minibatches = 2   # grid axis (parallel across TCs on v7x)
    batch = 64            # minibatch size per grid step
    state_size = 33
    action_size = 4

    state = jax.random.normal(
        k_state, (num_minibatches, batch, state_size), jnp.float32)
    raw_params = make_params(k_params, state_size, action_size)
    padded_params, ss, a_sz = prepare_actor_params(*raw_params)

    actions = actor_forward(state, *padded_params,
                            state_size=ss, action_size=a_sz)
    jax.block_until_ready(actions)

    # Pure-JAX f32 reference (per-minibatch BatchNorm, matching the kernel).
    # Kernel uses bf16 MXU operands + bf16 output, so a looser tolerance applies.
    w1, b1, w2, b2, w3, b3 = raw_params

    def ref_fwd(s):
        h1 = jnp.maximum(s @ w1 + b1, 0.0)
        mean = jnp.mean(h1, axis=0, keepdims=True)
        var = jnp.mean((h1 - mean) ** 2, axis=0, keepdims=True)
        h1 = (h1 - mean) / jnp.sqrt(var + _EPS)
        h2 = jnp.maximum(h1 @ w2 + b2, 0.0)
        return jnp.tanh(h2 @ w3 + b3)

    ref = jax.vmap(ref_fwd)(state)

    assert actions.shape == (num_minibatches, batch, action_size)
    assert jnp.allclose(actions, ref, atol=2e-2, rtol=2e-2), (
        float(jnp.max(jnp.abs(actions - ref))))
    print("KERNEL_OK")
</pallas_src>

<mosaic_0001>
module attributes {stable_mosaic.version = 11 : i64} {
  func.func @_actor_kernel(%arg0: i32, %arg1: memref<1x64x33xf32, #tpu.memory_space<vmem>>, %arg2: memref<128x256xbf16, #tpu.memory_space<vmem>>, %arg3: memref<1x256xf32, #tpu.memory_space<vmem>>, %arg4: memref<256x128xbf16, #tpu.memory_space<vmem>>, %arg5: memref<1x128xf32, #tpu.memory_space<vmem>>, %arg6: memref<128x128xbf16, #tpu.memory_space<vmem>>, %arg7: memref<1x128xf32, #tpu.memory_space<vmem>>, %arg8: memref<1x64x128xbf16, #tpu.memory_space<vmem>>, %arg9: memref<64x128xf32, #tpu.memory_space<vmem>>) attributes {dimension_semantics = [#tpu.dimension_semantics<parallel>], iteration_bounds = array<i64: 2>, scalar_prefetch = 0 : i64, scratch_operands = 1 : i64, tpu.core_type = #tpu.core_type<tc>, window_params = [{transform_indices = @transform_0, window_bounds = array<i64: 1, 64, 33>}, {pipeline_mode = #tpu.pipeline_mode<synchronous>, transform_indices = @transform_1, window_bounds = array<i64: 128, 256>}, {pipeline_mode = #tpu.pipeline_mode<synchronous>, transform_indices = @transform_2, window_bounds = array<i64: 1, 256>}, {pipeline_mode = #tpu.pipeline_mode<synchronous>, transform_indices = @transform_3, window_bounds = array<i64: 256, 128>}, {pipeline_mode = #tpu.pipeline_mode<synchronous>, transform_indices = @transform_4, window_bounds = array<i64: 1, 128>}, {pipeline_mode = #tpu.pipeline_mode<synchronous>, transform_indices = @transform_5, window_bounds = array<i64: 128, 128>}, {pipeline_mode = #tpu.pipeline_mode<synchronous>, transform_indices = @transform_6, window_bounds = array<i64: 1, 128>}, {transform_indices = @transform_7, window_bounds = array<i64: 1, 64, 128>}]} {
    %cst = arith.constant 0.000000e+00 : f32
    %0 = vector.broadcast %cst : f32 to vector<64x128xf32>
    %c0 = arith.constant 0 : index
    %c0_0 = arith.constant 0 : index
    %1 = vector.load %arg9[%c0, %c0_0] : memref<64x128xf32, #tpu.memory_space<vmem>>, vector<64x128xf32>
    tpu.vector_store %arg9[%c0, %c0_0], %0 {strides = array<i32>} : memref<64x128xf32, #tpu.memory_space<vmem>>, vector<64x128xf32>,
    %c0_1 = arith.constant 0 : index
    %c0_2 = arith.constant 0 : index
    %c0_3 = arith.constant 0 : index
    %2 = vector.load %arg1[%c0_1, %c0_2, %c0_3] : memref<1x64x33xf32, #tpu.memory_space<vmem>>, vector<1x64x33xf32>
    %3 = vector.shape_cast %2 : vector<1x64x33xf32> to vector<64x33xf32>
    %c0_4 = arith.constant 0 : index
    %c0_5 = arith.constant 0 : index
    %4 = vector.load %arg9[%c0_4, %c0_5] : memref<64x128xf32, #tpu.memory_space<vmem>>, vector<64x33xf32>
    tpu.vector_store %arg9[%c0_4, %c0_5], %3 {strides = array<i32>} : memref<64x128xf32, #tpu.memory_space<vmem>>, vector<64x33xf32>,
    %c0_6 = arith.constant 0 : index
    %c0_7 = arith.constant 0 : index
    %5 = vector.load %arg9[%c0_6, %c0_7] : memref<64x128xf32, #tpu.memory_space<vmem>>, vector<64x128xf32>
    %6 = arith.truncf %5 : vector<64x128xf32> to vector<64x128xbf16>
    %c0_8 = arith.constant 0 : index
    %c0_9 = arith.constant 0 : index
    %7 = vector.load %arg2[%c0_8, %c0_9] : memref<128x256xbf16, #tpu.memory_space<vmem>>, vector<128x256xbf16>
    %cst_10 = arith.constant dense<0.000000e+00> : vector<64x256xf32>
    %8 = tpu.matmul %6, %7, %cst_10 {dimension_numbers = #tpu.dot_dimension_numbers<[1], [0], [0], [1], [0, 0, 1, 1], [], []>} : vector<64x128xbf16>, vector<128x256xbf16>, vector<64x256xf32> -> vector<64x256xf32>
    %c0_11 = arith.constant 0 : index
    %c0_12 = arith.constant 0 : index
    %9 = vector.load %arg3[%c0_11, %c0_12] : memref<1x256xf32, #tpu.memory_space<vmem>>, vector<1x256xf32>
    %10 = vector.broadcast %9 : vector<1x256xf32> to vector<64x256xf32>
    %11 = arith.addf %8, %10 : vector<64x256xf32>
    %cst_13 = arith.constant 0.000000e+00 : f32
    %12 = vector.broadcast %cst_13 : f32 to vector<64x256xf32>
    %13 = arith.maximumf %11, %12 : vector<64x256xf32>
    %cst_14 = arith.constant dense<0.000000e+00> : vector<256xf32>
    %14 = vector.multi_reduction <add>, %13, %cst_14 [0] : vector<64x256xf32> to vector<256xf32>
    %15 = vector.shape_cast %14 : vector<256xf32> to vector<1x256xf32>
    %cst_15 = arith.constant 1.562500e-02 : f32
    %16 = vector.broadcast %cst_15 : f32 to vector<1x256xf32>
    %17 = arith.mulf %15, %16 : vector<1x256xf32>
    %18 = arith.mulf %13, %13 : vector<64x256xf32>
    %cst_16 = arith.constant dense<0.000000e+00> : vector<256xf32>
    %19 = vector.multi_reduction <add>, %18, %cst_16 [0] : vector<64x256xf32> to vector<256xf32>
    %20 = vector.shape_cast %19 : vector<256xf32> to vector<1x256xf32>
    %cst_17 = arith.constant 1.562500e-02 : f32
    %21 = vector.broadcast %cst_17 : f32 to vector<1x256xf32>
    %22 = arith.mulf %20, %21 : vector<1x256xf32>
    %23 = arith.mulf %17, %17 : vector<1x256xf32>
    %24 = arith.subf %22, %23 : vector<1x256xf32>
    %cst_18 = arith.constant 0.000000e+00 : f32
    %25 = vector.broadcast %cst_18 : f32 to vector<1x256xf32>
    %26 = arith.maximumf %24, %25 : vector<1x256xf32>
    %27 = vector.broadcast %17 : vector<1x256xf32> to vector<64x256xf32>
    %28 = arith.subf %13, %27 : vector<64x256xf32>
    %cst_19 = arith.constant 9.99999974E-6 : f32
    %29 = vector.broadcast %cst_19 : f32 to vector<1x256xf32>
    %30 = arith.addf %26, %29 : vector<1x256xf32>
    %31 = math.rsqrt %30 : vector<1x256xf32>
    %32 = vector.broadcast %31 : vector<1x256xf32> to vector<64x256xf32>
    %33 = arith.mulf %28, %32 : vector<64x256xf32>
    %34 = arith.truncf %33 : vector<64x256xf32> to vector<64x256xbf16>
    %c0_20 = arith.constant 0 : index
    %c0_21 = arith.constant 0 : index
    %35 = vector.load %arg4[%c0_20, %c0_21] : memref<256x128xbf16, #tpu.memory_space<vmem>>, vector<256x128xbf16>
    %cst_22 = arith.constant dense<0.000000e+00> : vector<64x128xf32>
    %36 = tpu.matmul %34, %35, %cst_22 {dimension_numbers = #tpu.dot_dimension_numbers<[1], [0], [0], [1], [0, 0, 1, 1], [], []>} : vector<64x256xbf16>, vector<256x128xbf16>, vector<64x128xf32> -> vector<64x128xf32>
    %c0_23 = arith.constant 0 : index
    %c0_24 = arith.constant 0 : index
    %37 = vector.load %arg5[%c0_23, %c0_24] : memref<1x128xf32, #tpu.memory_space<vmem>>, vector<1x128xf32>
    %38 = vector.broadcast %37 : vector<1x128xf32> to vector<64x128xf32>
    %39 = arith.addf %36, %38 : vector<64x128xf32>
    %cst_25 = arith.constant 0.000000e+00 : f32
    %40 = vector.broadcast %cst_25 : f32 to vector<64x128xf32>
    %41 = arith.maximumf %39, %40 : vector<64x128xf32>
    %42 = arith.truncf %41 : vector<64x128xf32> to vector<64x128xbf16>
    %c0_26 = arith.constant 0 : index
    %c0_27 = arith.constant 0 : index
    %43 = vector.load %arg6[%c0_26, %c0_27] : memref<128x128xbf16, #tpu.memory_space<vmem>>, vector<128x128xbf16>
    %cst_28 = arith.constant dense<0.000000e+00> : vector<64x128xf32>
    %44 = tpu.matmul %42, %43, %cst_28 {dimension_numbers = #tpu.dot_dimension_numbers<[1], [0], [0], [1], [0, 0, 1, 1], [], []>} : vector<64x128xbf16>, vector<128x128xbf16>, vector<64x128xf32> -> vector<64x128xf32>
    %c0_29 = arith.constant 0 : index
    %c0_30 = arith.constant 0 : index
    %45 = vector.load %arg7[%c0_29, %c0_30] : memref<1x128xf32, #tpu.memory_space<vmem>>, vector<1x128xf32>
    %46 = vector.broadcast %45 : vector<1x128xf32> to vector<64x128xf32>
    %47 = arith.addf %44, %46 : vector<64x128xf32>
    %48 = math.tanh %47 : vector<64x128xf32>
    %49 = arith.truncf %48 : vector<64x128xf32> to vector<64x128xbf16>
    %c0_31 = arith.constant 0 : index
    %c0_32 = arith.constant 0 : index
    %c0_33 = arith.constant 0 : index
    %50 = vector.load %arg8[%c0_31, %c0_32, %c0_33] : memref<1x64x128xbf16, #tpu.memory_space<vmem>>, vector<1x64x128xbf16>
    %51 = vector.shape_cast %50 : vector<1x64x128xbf16> to vector<64x128xbf16>
    %52 = vector.shape_cast %49 : vector<64x128xbf16> to vector<1x64x128xbf16>
    tpu.vector_store %arg8[%c0_31, %c0_32, %c0_33], %52 {strides = array<i32>} : memref<1x64x128xbf16, #tpu.memory_space<vmem>>, vector<1x64x128xbf16>,
    return
  }
  func.func @transform_0(%arg0: i32) -> (i32, i32, i32) {
    %c0_i32 = arith.constant 0 : i32
    %c0_i32_0 = arith.constant 0 : i32
    %c0_i32_1 = arith.constant 0 : i32
    return %arg0, %c0_i32, %c0_i32_0 : i32, i32, i32
  }
  func.func @transform_1(%arg0: i32) -> (i32, i32) {
    %c0_i32 = arith.constant 0 : i32
    %c0_i32_0 = arith.constant 0 : i32
    %c0_i32_1 = arith.constant 0 : i32
    return %c0_i32, %c0_i32_0 : i32, i32
  }
  func.func @transform_2(%arg0: i32) -> (i32, i32) {
    %c0_i32 = arith.constant 0 : i32
    %c0_i32_0 = arith.constant 0 : i32
    %c0_i32_1 = arith.constant 0 : i32
    return %c0_i32, %c0_i32_0 : i32, i32
  }
  func.func @transform_3(%arg0: i32) -> (i32, i32) {
    %c0_i32 = arith.constant 0 : i32
    %c0_i32_0 = arith.constant 0 : i32
    %c0_i32_1 = arith.constant 0 : i32
    return %c0_i32, %c0_i32_0 : i32, i32
  }
  func.func @transform_4(%arg0: i32) -> (i32, i32) {
    %c0_i32 = arith.constant 0 : i32
    %c0_i32_0 = arith.constant 0 : i32
    %c0_i32_1 = arith.constant 0 : i32
    return %c0_i32, %c0_i32_0 : i32, i32
  }
  func.func @transform_5(%arg0: i32) -> (i32, i32) {
    %c0_i32 = arith.constant 0 : i32
    %c0_i32_0 = arith.constant 0 : i32
    %c0_i32_1 = arith.constant 0 : i32
    return %c0_i32, %c0_i32_0 : i32, i32
  }
  func.func @transform_6(%arg0: i32) -> (i32, i32) {
    %c0_i32 = arith.constant 0 : i32
    %c0_i32_0 = arith.constant 0 : i32
    %c0_i32_1 = arith.constant 0 : i32
    return %c0_i32, %c0_i32_0 : i32, i32
  }
  func.func @transform_7(%arg0: i32) -> (i32, i32, i32) {
    %c0_i32 = arith.constant 0 : i32
    %c0_i32_0 = arith.constant 0 : i32
    %c0_i32_1 = arith.constant 0 : i32
    return %arg0, %c0_i32, %c0_i32_0 : i32, i32, i32
  }
}

</mosaic_0001>

<bundles_post_ra>
// kernel: actor_forward.1
= control target key start
LH: loop header
LB: loop body
LE: loop exit
PB: predicated region body
PF: predicated region fallthrough
CT: control target
= control target key end

     0   :  { %12 = vsyncpa [#allocation4], 0  ;;  %s1476_s24 = smov 0   ;;  %s1758_s0 = inlined_call_operand.vmem [shape: f32[2,64,33], index: 0, kind: input, shape index: {}]   ;;  %s1759_s1 = inlined_call_operand.vmem [shape: bf16[128,256], index: 1, kind: input, shape index: {}]   ;;  %s1760_s2 = inlined_call_operand.vmem [shape: f32[1,256], index: 2, kind: input, shape index: {}]   ;;  %s1761_s3 = inlined_call_operand.hbm [shape: bf16[256,128], index: 3, kind: input, shape index: {}]   ;;  %s1762_s4 = inlined_call_operand.vmem [shape: f32[1,128], index: 4, kind: input, shape index: {}]   ;;  %s1763_s5 = inlined_call_operand.vmem [shape: bf16[128,128], index: 5, kind: input, shape index: {}]   ;;  %s1764_s6 = inlined_call_operand.vmem [shape: f32[1,128], index: 6, kind: input, shape index: {}]   ;;  %s1765_s7 = inlined_call_operand.vmem [shape: bf16[2,64,128], index: 7, kind: output, shape index: {}]  }
   0x1 LB: > { %s1482_s25 = sadd.s32 4294967295, %s1429_s24   ;;  %p1116_p0 = scmp.ge.s32.totalorder %s1429_s24, 1  ;;  %s1429_s24 = sphi %s1476_s24, %s18_s24  }
   0x2   : > { %p201_p1 = scmp.lt.s32.totalorder %s1429_s24, 3  ;;  %s1431_s26 = smov [#allocation3]  }
   0x3   : > { %s219_s27 = sshll.u32 %s1431_s26, 4  ;;  %p1310_p3 = scmp.eq.s32.totalorder %s1482_s25, 0  ;;  %s220_s27 = int_to_ptr.vmem [resolvable:$true] %s219_s27 }
   0x4   : > { %p1486_p2 = pnand %p1116_p0, %p201_p1  ;;  %s1404_s29 = scalar_lea.vmem %s220_s27, 2048 }
   0x5   : > { %p1405_p7 = scmp.ne.s32.totalorder %s220_s27, %s1404_s29  ;;  %p1412_p10 = scmp.lt.s32.totalorder %s220_s27, %s220_s27 }
   0x6   : > { %p1306_p4 = pneg %p1486_p2  ;;  %p1413_p11 = scmp.lt.s32.totalorder %s1404_s29, %s1404_s29 }
   0x8   : > { %p1307_p5 = pnand %p1310_p3, %p1306_p4  ;;  %p1414_p12 = por %p1413_p11, %p1412_p10 }
   0xa   : > { %p1395_p6 = pneg %p1307_p5 }
   0xc   : > { %p1407_p8 = pnand %p1405_p7, %p1395_p6 }
   0xe   : > { %p1408_p9 = pneg %p1407_p8 }
  0x10   : > { %p1415_p13 = pnand %p1414_p12, %p1408_p9 }
  0x12   : > { %1418 = shalt.err (!%p1415_p13)
}
  0x13   : > { %s1432_s30 = smov 64   ;;  %s1433_s8 = smov 4  }
  0x14   : > { %1309 = dma.hbm_to_vmem [thread:$0]  (!%p1307_p5), %s1761_s3, 2048, %s220_s27, [#allocation4], %s1432_s30, %s1432_s30, %s1433_s8  }
  0x15   : > { %252 = sbr.rel (%p1486_p2) target bundleno = 780 (0x30c), region = 48 }
  0x1a   : > { %1424 = dma.done.wait (%p1310_p3), [#allocation4], 2048  }
  0x1b   : > { %1426 = vsyncadd (%p1310_p3), [#allocation4], 4294965248  ;;  %v1434_v0 = vmov 0   ;;  %v1435_v1 = vmov 0.0   ;;  %p284_p0 = scmp.lt.s32.totalorder %s1482_s25, 1  ;;  %vm311_vm0 = vcmask 269312   ;;  %v350_v57 = vlaneseq }
  0x1c   : > { %472 = vmatprep.mubr.bf16.mxu0 %v1434_v0  ;;  %295 = vst [vmem:[#allocation2] sm:$0xff] %v1435_v1  ;;  %296 = vst [vmem:[#allocation2 + $0x8] sm:$0xff] %v1435_v1  ;;  %v1325_v2 = vld [vmem:[%s1759_s1 + $0x74] ss:$8 sps:$4 sm:$0xff]   ;;  %v1327_v3 = vld [vmem:[%s1759_s1 + $0x70] ss:$8 sps:$4 sm:$0xff]  }
  0x1d   : > { %297 = vst [vmem:[#allocation2 + $0x10] sm:$0xff] %v1435_v1  ;;  %298 = vst [vmem:[#allocation2 + $0x18] sm:$0xff] %v1435_v1  ;;  %s1768_s25 = smov (!%p284_p0, %s1482_s25), 1  ;;  %440 = vmatprep.subr.bf16.mxu0 %v1325_v2  ;;  %v1328_v4 = vld [vmem:[%s1759_s1 + $0x64] ss:$8 sps:$4 sm:$0xff]   ;;  %v1349_v38 = vld [vmem:[#allocation3 + $0x78] sm:$0xff]  }
  0x1e   : > { %299 = vst [vmem:[#allocation2 + $0x20] sm:$0xff] %v1435_v1  ;;  %300 = vst [vmem:[#allocation2 + $0x28] sm:$0xff] %v1435_v1  ;;  %441 = vmatpush1.bf16.msra.mxu0 %v1327_v3  ;;  %v1330_v5 = vld [vmem:[%s1759_s1 + $0x60] ss:$8 sps:$4 sm:$0xff]   ;;  %v1331_v6 = vld [vmem:[%s1759_s1 + $0x54] ss:$8 sps:$4 sm:$0xff]   ;;  %1210 = vmatprep.subr.bf16.mxu1 %v1349_v38 }
  0x1f   : > { %301 = vst [vmem:[#allocation2 + $0x30] sm:$0xff] %v1435_v1  ;;  %302 = vst [vmem:[#allocation2 + $0x38] sm:$0xff] %v1435_v1  ;;  %442 = vmatprep.subr.bf16.mxu0 %v1328_v4  ;;  %s1177_s21 = sshll.u32 %s1768_s25, 6  ;;  %v1333_v7 = vld [vmem:[%s1759_s1 + $0x50] ss:$8 sps:$4 sm:$0xff]   ;;  %v1353_v42 = vld [vmem:[#allocation3 + $0x68] sm:$0xff]  }
  0x20   : > { %s288_s28 = scalar_lea.vmem %s1758_s0, %s1177_s21  ;;  %v1334_v8 = vld [vmem:[%s1759_s1 + $0x44] ss:$8 sps:$4 sm:$0xff]   ;;  %v1336_v9 = vld [vmem:[%s1759_s1 + $0x40] ss:$8 sps:$4 sm:$0xff]   ;;  %v1337_v10 = vld [vmem:[%s1759_s1 + $0x34] ss:$8 sps:$4 sm:$0xff]  }
  0x21   : > { %v303_v11 = vld [vmem:[%s288_s28] sm:$0xff]  ;;  %v304_v12 = vld [vmem:[%s288_s28 + $0x8] sm:$0xff]  ;;  %v305_v13 = vld [vmem:[%s288_s28 + $0x10] sm:$0xff]  ;;  %v351_v58 = vshrl.u32 %v350_v57, 7  ;;  %s1178_s29 = sshll.u32 %s1768_s25, 5 }
  0x22   : > { %443 = vmatpush1.bf16.msra.mxu0 %v1330_v5  ;;  %312 = vst.msk [vmem:[#allocation2] sm:$0xff] %vm311_vm0, %v303_v11  ;;  %v306_v14 = vld [vmem:[%s288_s28 + $0x18] sm:$0xff]  ;;  %313 = vst.msk [vmem:[#allocation2 + $0x8] sm:$0xff] %vm311_vm0, %v304_v12  ;;  %v307_v15 = vld [vmem:[%s288_s28 + $0x20] sm:$0xff]  ;;  %s293_s9 = scalar_lea.vmem %s1765_s7, %s1178_s29 }
  0x23   : > { %444 = vmatprep.subr.bf16.mxu0 %v1331_v6  ;;  %314 = vst.msk [vmem:[#allocation2 + $0x10] sm:$0xff] %vm311_vm0, %v305_v13  ;;  %315 = vst.msk [vmem:[#allocation2 + $0x18] sm:$0xff] %vm311_vm0, %v306_v14  ;;  %v308_v16 = vld [vmem:[%s288_s28 + $0x28] sm:$0xff]  ;;  %v309_v17 = vld [vmem:[%s288_s28 + $0x30] sm:$0xff]  ;;  %v352_v61 = vsub.s32 0, %v351_v58 }
  0x24   : > { %v1339_v18 = vld [vmem:[%s1759_s1 + $0x30] ss:$8 sps:$4 sm:$0xff]   ;;  %316 = vst.msk [vmem:[#allocation2 + $0x20] sm:$0xff] %vm311_vm0, %v307_v15  ;;  %317 = vst.msk [vmem:[#allocation2 + $0x28] sm:$0xff] %vm311_vm0, %v308_v16  ;;  %v1340_v20 = vld [vmem:[%s1759_s1 + $0x24] ss:$8 sps:$4 sm:$0xff]  }
  0x25   : > { %v310_v19 = vld [vmem:[%s288_s28 + $0x38] sm:$0xff]  ;;  %318 = vst.msk [vmem:[#allocation2 + $0x30] sm:$0xff] %vm311_vm0, %v309_v17  ;;  %v1342_v21 = vld [vmem:[%s1759_s1 + $0x20] ss:$8 sps:$4 sm:$0xff]   ;;  %v1346_v24 = vld [vmem:[%s1759_s1 + $0x4] ss:$8 sps:$4 sm:$0xff]  }
  0x26   : > { %445 = vmatpush1.bf16.msra.mxu0 %v1333_v7  ;;  %319 = vst.msk [vmem:[#allocation2 + $0x38] sm:$0xff] %vm311_vm0, %v310_v19  ;;  %v1343_v22 = vld [vmem:[%s1759_s1 + $0x14] ss:$8 sps:$4 sm:$0xff]   ;;  %v1345_v23 = vld [vmem:[%s1759_s1 + $0x10] ss:$8 sps:$4 sm:$0xff]   ;;  %v1354_v43 = vld [vmem:[#allocation3 + $0x28] sm:$0xff]  }
  0x27   : > { %446 = vmatprep.subr.bf16.mxu0 %v1334_v8  ;;  %v1348_v25 = vld [vmem:[%s1759_s1] ss:$8 sps:$4 sm:$0xff]   ;;  %v1350_v39 = vld [vmem:[#allocation3 + $0x38] sm:$0xff]   ;;  %v1351_v40 = vld [vmem:[#allocation3 + $0x70] sm:$0xff]  }
  0x28   : > { %1211 = vmatpush3.bf16.msra.mxu1 %v1350_v39  ;;  %v1352_v41 = vld [vmem:[#allocation3 + $0x30] sm:$0xff]   ;;  %v1355_v44 = vld [vmem:[#allocation3 + $0x60] sm:$0xff]   ;;  %v1357_v46 = vld [vmem:[#allocation3 + $0x58] sm:$0xff]  }
  0x29   : > { %v320_v26 = vld [vmem:[#allocation2] sm:$0xff]  ;;  %v321_v27 = vld [vmem:[#allocation2 + $0x8] sm:$0xff]  ;;  %1212 = vmatprep.subr.bf16.mxu1 %v1351_v40  ;;  %v1358_v47 = vld [vmem:[#allocation3 + $0x18] sm:$0xff]  }
  0x2a   : > { %447 = vmatpush1.bf16.msra.mxu0 %v1336_v9  ;;  %v328_v28 = vpack.c.bf16 %v321_v27, %v320_v26  ;;  %v322_v29 = vld [vmem:[#allocation2 + $0x10] sm:$0xff]  ;;  %v323_v30 = vld [vmem:[#allocation2 + $0x18] sm:$0xff]  ;;  %v1356_v45 = vld [vmem:[#allocation3 + $0x20] sm:$0xff]  }
  0x2b   : > { %448 = vmatprep.subr.bf16.mxu0 %v1337_v10  ;;  %v329_v31 = vpack.c.bf16 %v323_v30, %v322_v29  ;;  %v324_v32 = vld [vmem:[#allocation2 + $0x20] sm:$0xff]  ;;  %v325_v33 = vld [vmem:[#allocation2 + $0x28] sm:$0xff]  ;;  %v1359_v48 = vld [vmem:[#allocation3 + $0x50] sm:$0xff]  }
  0x2c   : > { %v330_v34 = vpack.c.bf16 %v325_v33, %v324_v32  ;;  %v326_v35 = vld [vmem:[#allocation2 + $0x30] sm:$0xff]  ;;  %1213 = vmatpush3.bf16.msra.mxu1 %v1352_v41  ;;  %v1361_v50 = vld [vmem:[#allocation3 + $0x48] sm:$0xff]   ;;  %v1363_v52 = vld [vmem:[#allocation3 + $0x40] sm:$0xff]  }
  0x2d   : > { %v327_v36 = vld [vmem:[#allocation2 + $0x38] sm:$0xff]  ;;  %1214 = vmatprep.subr.bf16.mxu1 %v1353_v42  ;;  %v1360_v49 = vld [vmem:[#allocation3 + $0x10] sm:$0xff]   ;;  %v1362_v51 = vld [vmem:[#allocation3 + $0x8] sm:$0xff]  }
  0x2e   : > { %449 = vmatpush1.bf16.msra.mxu0 %v1339_v18  ;;  %v331_v37 = vpack.c.bf16 %v327_v36, %v326_v35  ;;  %v1364_v53 = vld [vmem:[#allocation3] sm:$0xff]   ;;  %v1575_v54 = vld [vmem:[%s1763_s5 + $0x38] sm:$0xff]   ;;  %v1580_v55 = vld [vmem:[%s1763_s5 + $0x30] sm:$0xff]  }
  0x2f   : > { %450 = vmatprep.subr.bf16.mxu0 %v1340_v20  ;;  %v1589_v56 = vld [vmem:[%s1763_s5 + $0x28] sm:$0xff]   ;;  %v348_v62 = vld [vmem:[%s1760_s2] sm:$0x3] }
  0x30   : > { %1215 = vmatpush3.bf16.msra.mxu1 %v1354_v43  ;;  %v1597_v2 = vrot.slane %v348_v62, %v352_v61 }
  0x31   : > { %1216 = vmatprep.subr.bf16.mxu1 %v1355_v44 }
  0x32   : > { %451 = vmatpush1.bf16.msra.mxu0 %v1342_v21 }
  0x33   : > { %452 = vmatprep.subr.bf16.mxu0 %v1343_v22 }
  0x34   : > { %1217 = vmatpush3.bf16.msra.mxu1 %v1356_v45 }
  0x35   : > { %1218 = vmatprep.subr.bf16.mxu1 %v1357_v46 }
  0x36   : > { %453 = vmatpush1.bf16.msra.mxu0 %v1345_v23 }
  0x37   : > { %454 = vmatprep.subr.bf16.mxu0 %v1346_v24 }
  0x38   : > { %1219 = vmatpush3.bf16.msra.mxu1 %v1358_v47 }
  0x39   : > { %1220 = vmatprep.subr.bf16.mxu1 %v1359_v48 }
  0x3a   : > { %455 = vmatpush1.bf16.msra.mxu0 %v1348_v25 }
  0x3b   : > { %1262 = vmatprep.subr.bf16.mxu0 %v1575_v54 }
  0x3c   : > { %1221 = vmatpush3.bf16.msra.mxu1 %v1360_v49 }
  0x3d   : > { %473 = vmatmul.mubr.bf16.vlgmr.msra.gmra.mxu0 %v328_v28  ;;  %1222 = vmatprep.subr.bf16.mxu1 %v1361_v50 }
  0x3e   : > { %482 = vmatprep.mubr.bf16.mxu0 %v1434_v0  ;;  %1263 = vmatpush3.bf16.msra.mxu0 %v1575_v54 }
  0x3f   : > { %1264 = vmatprep.subr.bf16.mxu0 %v1580_v55 }
  0x40   : > { %1223 = vmatpush3.bf16.msra.mxu1 %v1362_v51 }
  0x41   : > { %1224 = vmatprep.subr.bf16.mxu1 %v1363_v52 }
  0x42   : > { %1265 = vmatpush3.bf16.msra.mxu0 %v1580_v55 }
  0x43   : > { %1266 = vmatprep.subr.bf16.mxu0 %v1589_v56 }
  0x44   : > { %1225 = vmatpush3.bf16.msra.mxu1 %v1364_v53 }
  0x45   : > { %483 = vmatmul.mubr.bf16.gmra.mxu0 %v329_v31  ;;  %1286 = vmatprep.subr.bf16.mxu1 %v1575_v54 }
  0x46   : > { %492 = vmatprep.mubr.bf16.mxu0 %v1434_v0  ;;  %1267 = vmatpush3.bf16.msra.mxu0 %v1589_v56 }
  0x4d   : > { %493 = vmatmul.mubr.bf16.gmra.mxu0 %v330_v34 }
  0x4e   : > { %502 = vmatprep.mubr.bf16.mxu0 %v1434_v0  ;;  %v356_v0 = vsub.s32 1, %v351_v58 }
  0x50   : > { %v1599_v4 = vrot.slane %v348_v62, %v356_v0 }
  0x55   : > { %503 = vmatmul.mubr.bf16.gmra.mxu0 %v331_v37 }
  0xfd   : > { %v474_v59 = vpop.f32.mrf.mxu0 }
  0xfe   : > { %v475_v7 = vadd.f32 %v474_v59, %v1597_v2 }
  0xff   : > { %v476_v60 = vpop.f32.mrf.mxu0 }
 0x100   : > { %v477_v11 = vadd.f32 %v476_v60, %v1599_v4  ;;  %v1610_v16 = vmax.f32 %v475_v7, 0.0 }
 0x101   : > { %v478_v63 = vpop.f32.mrf.mxu0 }
 0x102   : > { %v479_v5 = vadd.f32 %v478_v63, %v1597_v2  ;;  %v1617_v21 = vmax.f32 %v477_v11, 0.0  ;;  %v557_v27 = vmul.f32 %v1610_v16, %v1610_v16 }
 0x103   : > { %v480_v1 = vpop.f32.mrf.mxu0 }
 0x104   : > { %v481_v8 = vadd.f32 %v480_v1, %v1599_v4  ;;  %v1606_v12 = vmax.f32 %v479_v5, 0.0  ;;  %v558_v34 = vmul.f32 %v1617_v21, %v1617_v21 }
 0x105   : > { %v484_v3 = vpop.f32.mrf.mxu0 }
 0x106   : > { %v485_v9 = vadd.f32 %v484_v3, %v1597_v2  ;;  %v1612_v17 = vmax.f32 %v481_v8, 0.0  ;;  %v559_v23 = vmul.f32 %v1606_v12, %v1606_v12  ;;  %v529_v35 = vadd.f32 %v1606_v12, %v1610_v16 }
 0x107   : > { %v486_v6 = vpop.f32.mrf.mxu0 }
 0x108   : > { %v487_v13 = vadd.f32 %v486_v6, %v1599_v4  ;;  %v1614_v18 = vmax.f32 %v485_v9, 0.0  ;;  %v560_v28 = vmul.f32 %v1612_v17, %v1612_v17  ;;  %v573_v37 = vadd.f32 %v559_v23, %v557_v27 }
 0x109   : > { %v488_v10 = vpop.f32.mrf.mxu0  ;;  %v542_v42 = vadd.f32 %v1612_v17, %v1617_v21 }
 0x10a   : > { %v489_v14 = vadd.f32 %v488_v10, %v1597_v2  ;;  %v1622_v24 = vmax.f32 %v487_v13, 0.0  ;;  %v561_v29 = vmul.f32 %v1614_v18, %v1614_v18  ;;  %v530_v43 = vadd.f32 %v529_v35, %v1614_v18 }
 0x10b   : > { %v490_v15 = vpop.f32.mrf.mxu0  ;;  %v586_v46 = vadd.f32 %v560_v28, %v558_v34 }
 0x10c   : > { %v491_v19 = vadd.f32 %v490_v15, %v1599_v4  ;;  %v1624_v25 = vmax.f32 %v489_v14, 0.0  ;;  %v562_v38 = vmul.f32 %v1622_v24, %v1622_v24  ;;  %v574_v47 = vadd.f32 %v573_v37, %v561_v29 }
 0x10d   : > { %v494_v20 = vpop.f32.mrf.mxu0  ;;  %v543_v51 = vadd.f32 %v542_v42, %v1622_v24 }
 0x10e   : > { %v495_v22 = vadd.f32 %v494_v20, %v1597_v2  ;;  %v1632_v30 = vmax.f32 %v491_v19, 0.0  ;;  %v563_v39 = vmul.f32 %v1624_v25, %v1624_v25  ;;  %v531_v52 = vadd.f32 %v530_v43, %v1624_v25 }
 0x10f   : > { %v496_v26 = vpop.f32.mrf.mxu0  ;;  %v587_v58 = vadd.f32 %v586_v46, %v562_v38 }
 0x110   : > { %v1634_v31 = vmax.f32 %v495_v22, 0.0  ;;  %v497_v32 = vadd.f32 %v496_v26, %v1599_v4  ;;  %v564_v48 = vmul.f32 %v1632_v30, %v1632_v30  ;;  %v575_v59 = vadd.f32 %v574_v47, %v563_v39 }
 0x111   : > { %v498_v33 = vpop.f32.mrf.mxu0  ;;  %v544_v63 = vadd.f32 %v543_v51, %v1632_v30 }
 0x112   : > { %v499_v36 = vadd.f32 %v498_v33, %v1597_v2  ;;  %v1646_v40 = vmax.f32 %v497_v32, 0.0  ;;  %v565_v49 = vmul.f32 %v1634_v31, %v1634_v31  ;;  %v532_v0 = vadd.f32 %v531_v52, %v1634_v31 }
 0x113   : > { %v500_v41 = vpop.f32.mrf.mxu0  ;;  %v588_v3 = vadd.f32 %v587_v58, %v564_v48 }
 0x114   : > { %v1651_v44 = vmax.f32 %v499_v36, 0.0  ;;  %v501_v45 = vadd.f32 %v500_v41, %v1599_v4  ;;  %v566_v60 = vmul.f32 %v1646_v40, %v1646_v40  ;;  %v576_v5 = vadd.f32 %v575_v59, %v565_v49 }
 0x115   : > { %v504_v50 = vpop.f32.mrf.mxu0  ;;  %v545_v9 = vadd.f32 %v544_v63, %v1646_v40 }
 0x116   : > { %v1660_v53 = vmax.f32 %v501_v45, 0.0  ;;  %v505_v57 = vadd.f32 %v504_v50, %v1597_v2  ;;  %v567_v61 = vmul.f32 %v1651_v44, %v1651_v44  ;;  %v533_v10 = vadd.f32 %v532_v0, %v1651_v44 }
 0x117   : > { %v506_v62 = vpop.f32.mrf.mxu0  ;;  %v589_v14 = vadd.f32 %v588_v3, %v566_v60 }
 0x118   : > { %v1669_v1 = vmax.f32 %v505_v57, 0.0  ;;  %v568_v6 = vmul.f32 %v1660_v53, %v1660_v53  ;;  %v507_v7 = vadd.f32 %v506_v62, %v1599_v4  ;;  %v577_v15 = vadd.f32 %v576_v5, %v567_v61 }
 0x119   : > { %v508_v8 = vpop.f32.mrf.mxu0  ;;  %v546_v22 = vadd.f32 %v545_v9, %v1660_v53 }
 0x11a   : > { %v569_v11 = vmul.f32 %v1669_v1, %v1669_v1  ;;  %v509_v13 = vadd.f32 %v508_v8, %v1597_v2  ;;  %v1679_v19 = vmax.f32 %v507_v7, 0.0  ;;  %v534_v23 = vadd.f32 %v533_v10, %v1669_v1 }
 0x11b   : > { %v510_v20 = vpop.f32.mrf.mxu0  ;;  %v590_v28 = vadd.f32 %v589_v14, %v568_v6 }
 0x11c   : > { %v1683_v26 = vmax.f32 %v509_v13, 0.0  ;;  %v511_v27 = vadd.f32 %v510_v20, %v1599_v4  ;;  %v578_v29 = vadd.f32 %v577_v15, %v569_v11  ;;  %v570_v32 = vmul.f32 %v1679_v19, %v1679_v19 }
 0x11d   : > { %v547_v2 = vadd.f32 %v546_v22, %v1679_v19 }
 0x11e   : > { %v535_v33 = vadd.f32 %v534_v23, %v1683_v26  ;;  %v571_v34 = vmul.f32 %v1683_v26, %v1683_v26  ;;  %v1692_v35 = vmax.f32 %v511_v27, 0.0  ;;  %v591_v36 = vadd.f32 %v590_v28, %v570_v32 }
 0x120   : > { %v536_v37 = vrot.slane %v535_v33, 4  ;;  %v579_v38 = vadd.f32 %v578_v29, %v571_v34  ;;  %v548_v39 = vadd.f32 %v547_v2, %v1692_v35  ;;  %v572_v4 = vmul.f32 %v1692_v35, %v1692_v35 }
 0x122   : > { %v537_v41 = vadd.f32 %v536_v37, %v535_v33  ;;  %v580_v42 = vrot.slane %v579_v38, 4  ;;  %v549_v43 = vrot.slane %v548_v39, 4  ;;  %v592_v45 = vadd.f32 %v591_v36, %v572_v4 }
 0x124   : > { %v538_v46 = vrot.slane %v537_v41, 2  ;;  %v581_v47 = vadd.f32 %v580_v42, %v579_v38  ;;  %v550_v48 = vadd.f32 %v549_v43, %v548_v39  ;;  %v593_v49 = vrot.slane %v592_v45, 4 }
 0x126   : > { %v539_v50 = vadd.f32 %v538_v46, %v537_v41  ;;  %v582_v51 = vrot.slane %v581_v47, 2  ;;  %v551_v52 = vrot.slane %v550_v48, 2  ;;  %v594_v57 = vadd.f32 %v593_v49, %v592_v45 }
 0x128   : > { %v540_v58 = vrot.slane %v539_v50, 1  ;;  %v583_v59 = vadd.f32 %v582_v51, %v581_v47  ;;  %v552_v60 = vadd.f32 %v551_v52, %v550_v48  ;;  %v595_v61 = vrot.slane %v594_v57, 2 }
 0x12a   : > { %v541_v62 = vadd.f32 %v540_v58, %v539_v50  ;;  %v584_v63 = vrot.slane %v583_v59, 1  ;;  %v553_v0 = vrot.slane %v552_v60, 1  ;;  %v596_v3 = vadd.f32 %v595_v61, %v594_v57 }
 0x12c   : > { %v1697_v5 = vmul.f32 0.015625, %v541_v62  ;;  %v585_v6 = vadd.f32 %v584_v63, %v583_v59  ;;  %v554_v7 = vadd.f32 %v553_v0, %v552_v60  ;;  %v597_v8 = vrot.slane %v596_v3, 1  ;;  %v1372_v0 = vld [vmem:[%s1763_s5] sm:$0xff]  }
 0x12e   : > { %v599_v9 = vmul.f32 0.015625, %v585_v6  ;;  %v601_v10 = vmul.f32 %v1697_v5, %v1697_v5  ;;  %v556_v11 = vmul.f32 0.015625, %v554_v7  ;;  %v598_v13 = vadd.f32 %v597_v8, %v596_v3  ;;  %v1141_v7 = vld [vmem:[%s1762_s4] ss:$0 sm:$0xff] }
 0x12f   : > { %v607_v2 = vsub.f32 %v1610_v16, %v1697_v5  ;;  %v609_v33 = vsub.f32 %v1606_v12, %v1697_v5  ;;  %v611_v12 = vsub.f32 %v1614_v18, %v1697_v5  ;;  %v621_v62 = vsub.f32 %v1683_v26, %v1697_v5  ;;  %v1371_v26 = vld [vmem:[%s1763_s5 + $0x8] sm:$0xff]  }
 0x130   : > { %v603_v14 = vsub.f32 %v599_v9, %v601_v10  ;;  %v602_v15 = vmul.f32 %v556_v11, %v556_v11  ;;  %v600_v20 = vmul.f32 0.015625, %v598_v13  ;;  %v608_v34 = vsub.f32 %v1617_v21, %v556_v11 }
 0x131   : > { %v610_v36 = vsub.f32 %v1612_v17, %v556_v11  ;;  %v612_v37 = vsub.f32 %v1622_v24, %v556_v11  ;;  %v614_v38 = vsub.f32 %v1632_v30, %v556_v11  ;;  %v613_v17 = vsub.f32 %v1624_v25, %v1697_v5 }
 0x132   : > { %v605_v22 = vmax.f32 %v603_v14, 0.0  ;;  %v604_v23 = vsub.f32 %v600_v20, %v602_v15  ;;  %v616_v21 = vsub.f32 %v1646_v40, %v556_v11  ;;  %v618_v24 = vsub.f32 %v1660_v53, %v556_v11 }
 0x133   : > { %v615_v25 = vsub.f32 %v1634_v31, %v1697_v5  ;;  %v617_v40 = vsub.f32 %v1651_v44, %v1697_v5  ;;  %v620_v53 = vsub.f32 %v1679_v19, %v556_v11  ;;  %v619_v31 = vsub.f32 %v1669_v1, %v1697_v5  ;;  %v1369_v19 = vld [vmem:[%s1763_s5 + $0x18] sm:$0xff]   ;;  %v1370_v1 = vld [vmem:[%s1763_s5 + $0x10] sm:$0xff]  }
 0x134   : > { %v623_v27 = vadd.f32 1e-05, %v605_v22  ;;  %v606_v28 = vmax.f32 %v604_v23, 0.0 }
 0x136   : > { %1373 = vrsqrt.f32 %v623_v27  ;;  %v624_v29 = vadd.f32 1e-05, %v606_v28 }
 0x138   : > { %1375 = vrsqrt.f32 %v624_v29 }
 0x143   : > { %v1374_v32 = vpop.eup %1373 }
 0x144   : > { %v627_v4 = vmul.f32 %v1374_v32, %v607_v2  ;;  %v629_v41 = vmul.f32 %v1374_v32, %v609_v33  ;;  %v631_v30 = vmul.f32 %v1374_v32, %v611_v12  ;;  %v633_v49 = vmul.f32 %v1374_v32, %v613_v17 }
 0x145   : > { %v1376_v39 = vpop.eup %1375  ;;  %v635_v57 = vmul.f32 %v1374_v32, %v615_v25  ;;  %v639_v44 = vmul.f32 %v1374_v32, %v619_v31 }
 0x146   : > { %v628_v42 = vmul.f32 %v1376_v39, %v608_v34  ;;  %v630_v43 = vmul.f32 %v1376_v39, %v610_v36  ;;  %v632_v45 = vmul.f32 %v1376_v39, %v612_v37  ;;  %v634_v46 = vmul.f32 %v1376_v39, %v614_v38 }
 0x147   : > { %v643_v16 = vpack.c.bf16 %v629_v41, %v627_v4  ;;  %v636_v50 = vmul.f32 %v1376_v39, %v616_v21  ;;  %v638_v51 = vmul.f32 %v1376_v39, %v618_v24  ;;  %v645_v52 = vpack.c.bf16 %v633_v49, %v631_v30 }
 0x148   : > { %v644_v47 = vpack.c.bf16 %v630_v43, %v628_v42  ;;  %v646_v48 = vpack.c.bf16 %v634_v46, %v632_v45  ;;  %v640_v58 = vmul.f32 %v1376_v39, %v620_v53 }
 0x149   : > { %v648_v18 = vpack.c.bf16 %v638_v51, %v636_v50 }
 0x14a   : > { %818 = vmatprep.mubr.bf16.mxu1 %v644_v47 }
 0x14b   : > { %819 = vmatmul.mubr.bf16.vlgmr.msra.gmra.mxu1 %v643_v16 }
 0x14c   : > { %826 = vmatprep.mubr.bf16.mxu1 %v646_v48  ;;  %1294 = vmatpush3.bf16.msra.mxu1 %v1575_v54  ;;  %v622_v54 = vsub.f32 %v1692_v35, %v556_v11  ;;  %v641_v35 = vmul.f32 %v1374_v32, %v621_v62 }
 0x14d   : > { %1287 = vmatprep.subr.bf16.mxu1 %v1580_v55 }
 0x14e   : > { %v642_v59 = vmul.f32 %v1376_v39, %v622_v54  ;;  %v649_v63 = vpack.c.bf16 %v641_v35, %v639_v44 }
 0x150   : > { %1295 = vmatpush3.bf16.msra.mxu1 %v1580_v55  ;;  %v637_v55 = vmul.f32 %v1374_v32, %v617_v40  ;;  %v650_v61 = vpack.c.bf16 %v642_v59, %v640_v58  ;;  %v1158_v40 = vld [vmem:[%s1764_s6] ss:$0 sm:$0xff] }
 0x151   : > { %1288 = vmatprep.subr.bf16.mxu1 %v1589_v56 }
 0x152   : > { %v647_v60 = vpack.c.bf16 %v637_v55, %v635_v57 }
 0x153   : > { %827 = vmatmul.mubr.bf16.gmra.mxu1 %v645_v52 }
 0x154   : > { %834 = vmatprep.mubr.bf16.mxu1 %v648_v18  ;;  %1296 = vmatpush3.bf16.msra.mxu1 %v1589_v56  ;;  %v1368_v56 = vld [vmem:[%s1763_s5 + $0x20] sm:$0xff]  }
 0x155   : > { %1268 = vmatprep.subr.bf16.mxu0 %v1368_v56  ;;  %1289 = vmatprep.subr.bf16.mxu1 %v1368_v56 }
 0x156   : > { %1269 = vmatpush3.bf16.msra.mxu0 %v1368_v56 }
 0x157   : > { %1270 = vmatprep.subr.bf16.mxu0 %v1369_v19 }
 0x158   : > { %1297 = vmatpush3.bf16.msra.mxu1 %v1368_v56 }
 0x159   : > { %1290 = vmatprep.subr.bf16.mxu1 %v1369_v19 }
 0x15a   : > { %1271 = vmatpush3.bf16.msra.mxu0 %v1369_v19 }
 0x15b   : > { %835 = vmatmul.mubr.bf16.gmra.mxu1 %v647_v60  ;;  %1272 = vmatprep.subr.bf16.mxu0 %v1370_v1 }
 0x15c   : > { %842 = vmatprep.mubr.bf16.mxu1 %v650_v61  ;;  %1298 = vmatpush3.bf16.msra.mxu1 %v1369_v19 }
 0x15d   : > { %1291 = vmatprep.subr.bf16.mxu1 %v1370_v1 }
 0x15e   : > { %1273 = vmatpush3.bf16.msra.mxu0 %v1370_v1 }
 0x15f   : > { %1274 = vmatprep.subr.bf16.mxu0 %v1371_v26 }
 0x160   : > { %1299 = vmatpush3.bf16.msra.mxu1 %v1370_v1 }
 0x161   : > { %1292 = vmatprep.subr.bf16.mxu1 %v1371_v26 }
 0x162   : > { %1275 = vmatpush3.bf16.msra.mxu0 %v1371_v26 }
 0x163   : > { %843 = vmatmul.mubr.bf16.gmra.mxu1 %v649_v63  ;;  %1276 = vmatprep.subr.bf16.mxu0 %v1372_v0 }
 0x164   : > { %1300 = vmatpush3.bf16.msra.mxu1 %v1371_v26 }
 0x165   : > { %1293 = vmatprep.subr.bf16.mxu1 %v1372_v0 }
 0x166   : > { %1277 = vmatpush3.bf16.msra.mxu0 %v1372_v0 }
 0x168   : > { %1301 = vmatpush3.bf16.msra.mxu1 %v1372_v0 }
 0x20b   : > { %v1226_v3 = vpop.f32.mrf.mxu1 }
 0x20d   : > { %v1227_v5 = vpop.f32.mrf.mxu1 }
 0x20e   : > { %v1228_v6 = vadd.f32 %v1227_v5, %v1226_v3 }
 0x20f   : > { %v1229_v8 = vpop.f32.mrf.mxu1 }
 0x210   : > { %v821_v10 = vadd.f32 %v1228_v6, %v1141_v7 }
 0x211   : > { %v1230_v9 = vpop.f32.mrf.mxu1 }
 0x212   : > { %v1231_v11 = vadd.f32 %v1230_v9, %v1229_v8  ;;  %v851_v20 = vmax.f32 %v821_v10, 0.0 }
 0x213   : > { %v1232_v13 = vpop.f32.mrf.mxu1 }
 0x214   : > { %v824_v14 = vadd.f32 %v1231_v11, %v1141_v7 }
 0x215   : > { %v1233_v15 = vpop.f32.mrf.mxu1 }
 0x216   : > { %v852_v22 = vmax.f32 %v824_v14, 0.0  ;;  %v1234_v23 = vadd.f32 %v1233_v15, %v1232_v13 }
 0x217   : > { %v1235_v27 = vpop.f32.mrf.mxu1 }
 0x218   : > { %v859_v28 = vpack.c.bf16 %v852_v22, %v851_v20  ;;  %v829_v32 = vadd.f32 %v1234_v23, %v1141_v7 }
 0x219   : > { %v1236_v29 = vpop.f32.mrf.mxu1 }
 0x21a   : > { %v1237_v2 = vadd.f32 %v1236_v29, %v1235_v27  ;;  %1278 = vmatprep.mubr.bf16.mxu0 %v859_v28  ;;  %v853_v37 = vmax.f32 %v829_v32, 0.0 }
 0x21b   : > { %v1238_v33 = vpop.f32.mrf.mxu1 }
 0x21c   : > { %v832_v34 = vadd.f32 %v1237_v2, %v1141_v7 }
 0x21d   : > { %v1239_v36 = vpop.f32.mrf.mxu1 }
 0x21e   : > { %v854_v38 = vmax.f32 %v832_v34, 0.0  ;;  %v1240_v39 = vadd.f32 %v1239_v36, %v1238_v33 }
 0x21f   : > { %v1241_v4 = vpop.f32.mrf.mxu1 }
 0x220   : > { %v860_v41 = vpack.c.bf16 %v854_v38, %v853_v37  ;;  %v837_v43 = vadd.f32 %v1240_v39, %v1141_v7 }
 0x221   : > { %v1242_v42 = vpop.f32.mrf.mxu1 }
 0x222   : > { %v1243_v45 = vadd.f32 %v1242_v42, %v1241_v4  ;;  %1279 = vmatmul.mubr.bf16.vlgmr.msra.gmra.mxu0 %v860_v41  ;;  %v855_v48 = vmax.f32 %v837_v43, 0.0 }
 0x223   : > { %v1244_v46 = vpop.f32.mrf.mxu1 }
 0x224   : > { %v840_v47 = vadd.f32 %v1243_v45, %v1141_v7 }
 0x225   : > { %v1245_v16 = vpop.f32.mrf.mxu1 }
 0x226   : > { %v856_v12 = vmax.f32 %v840_v47, 0.0  ;;  %v1246_v17 = vadd.f32 %v1245_v16, %v1244_v46 }
 0x227   : > { %v1247_v21 = vpop.f32.mrf.mxu1 }
 0x228   : > { %v861_v24 = vpack.c.bf16 %v856_v12, %v855_v48  ;;  %v845_v49 = vadd.f32 %v1246_v17, %v1141_v7 }
 0x229   : > { %v1248_v30 = vpop.f32.mrf.mxu1 }
 0x22a   : > { %v1249_v50 = vadd.f32 %v1248_v30, %v1247_v21  ;;  %1282 = vmatprep.mubr.bf16.mxu1 %v861_v24  ;;  %v857_v52 = vmax.f32 %v845_v49, 0.0 }
 0x22c   : > { %v848_v51 = vadd.f32 %v1249_v50, %v1141_v7 }
 0x22e   : > { %v858_v18 = vmax.f32 %v848_v51, 0.0 }
 0x230   : > { %v862_v25 = vpack.c.bf16 %v858_v18, %v857_v52 }
 0x232   : > { %1283 = vmatmul.mubr.bf16.vlgmr.msra.gmra.mxu1 %v862_v25 }
 0x2e2   : > { %v1280_v54 = vpop.f32.mrf.mxu0 }
 0x2e3   : > { %v977_v53 = vadd.f32 %v1280_v54, %v1158_v40 }
 0x2e4   : > { %v968_v57 = vpop.f32.mrf.mxu0 }
 0x2e5   : > { %v969_v55 = vadd.f32 %v1158_v40, %v968_v57  ;;  %1377 = vtanh.f32 %v977_v53 }
 0x2e6   : > { %v1281_v58 = vpop.f32.mrf.mxu0 }
 0x2e7   : > { %v980_v59 = vadd.f32 %v1281_v58, %v1158_v40 }
 0x2e8   : > { %v971_v60 = vpop.f32.mrf.mxu0 }
 0x2e9   : > { %1379 = vtanh.f32 %v980_v59  ;;  %v972_v61 = vadd.f32 %v1158_v40, %v971_v60 }
 0x2ea   : > { %1381 = vtanh.f32 %v969_v55 }
 0x2eb   : > { %1383 = vtanh.f32 %v972_v61 }
 0x2f2   : > { %v1284_v62 = vpop.f32.mrf.mxu1  ;;  %v1378_v35 = vpop.eup %1377 }
 0x2f3   : > { %v993_v31 = vadd.f32 %v1284_v62, %v1158_v40 }
 0x2f4   : > { %v984_v44 = vpop.f32.mrf.mxu1 }
 0x2f5   : > { %v985_v56 = vadd.f32 %v1158_v40, %v984_v44  ;;  %1385 = vtanh.f32 %v993_v31 }
 0x2f6   : > { %v1380_v63 = vpop.eup %1379  ;;  %v1285_v19 = vpop.f32.mrf.mxu1 }
 0x2f7   : > { %v1382_v1 = vpop.eup %1381  ;;  %v1195_v26 = vpack.c.bf16 %v1380_v63, %v1378_v35  ;;  %v996_v0 = vadd.f32 %v1285_v19, %v1158_v40 }
 0x2f8   : > { %v1384_v3 = vpop.eup %1383  ;;  %v987_v5 = vpop.f32.mrf.mxu1 }
 0x2f9   : > { %1207 = vst [vmem:[%s293_s9 + $0x8] sm:$0xff] %v1195_v26   ;;  %v1190_v6 = vpack.c.bf16 %v1384_v3, %v1382_v1  ;;  %1387 = vtanh.f32 %v996_v0  ;;  %v988_v7 = vadd.f32 %v1158_v40, %v987_v5 }
 0x2fa   : > { %1389 = vtanh.f32 %v985_v56 }
 0x2fb   : > { %1191 = vst [vmem:[%s293_s9] sm:$0xff] %v1190_v6   ;;  %1391 = vtanh.f32 %v988_v7 }
 0x302   : > { %v1386_v8 = vpop.eup %1385 }
 0x306   : > { %v1388_v9 = vpop.eup %1387 }
 0x307   : > { %v1390_v10 = vpop.eup %1389  ;;  %v1205_v11 = vpack.c.bf16 %v1388_v9, %v1386_v8 }
 0x308   : > { %v1392_v13 = vpop.eup %1391 }
 0x309   : > { %1209 = vst [vmem:[%s293_s9 + $0x18] sm:$0xff] %v1205_v11   ;;  %v1200_v14 = vpack.c.bf16 %v1392_v13, %v1390_v10 }
 0x30b   : > { %1208 = vst [vmem:[%s293_s9 + $0x10] sm:$0xff] %v1200_v14  }
 0x30c PF: > { %s18_s24 = sadd.s32 1, %s1429_s24  }
 0x30d   : > { %p15_p1 = scmp.ge.s32.totalorder %s18_s24, 4  }
 0x30f   :  { %17 = sbr.rel (!%p15_p1) target bundleno = 1 (0x1), region = 83 }
 0x314   :  { %1068 = vsyncpa [#allocation4], 1 }
 0x315   :  { %1070 = vsyncpa [#allocation4 + $0x1], 1 }

</bundles_post_ra>
